<compile_context>
chip_gen: v6e
topology: v6e:2x2x1
jax: 0.10.0
libtpu: 0.0.40
codegen_flags: <defaults>
</compile_context>

<pallas_src>
import functools

import jax
import jax.numpy as jnp
from jax.experimental import pallas as pl
from jax.experimental.pallas import tpu as pltpu


def _mono_linear_kernel_direct(x_ref, wt_ref, b_ref, o_ref, *, inv_scale):
    """f32 output: accumulate straight into the resident output tile."""
    k = pl.program_id(2)

    @pl.when(k == 0)
    def _():
        o_ref[...] = jnp.zeros_like(o_ref)

    o_ref[...] += jnp.dot(
        x_ref[...], wt_ref[...], preferred_element_type=jnp.float32
    )

    @pl.when(k == pl.num_programs(2) - 1)
    def _():
        o_ref[...] = (o_ref[...] + b_ref[...]) * inv_scale


def _mono_linear_kernel_scratch(x_ref, wt_ref, b_ref, o_ref, acc_ref, *, inv_scale):
    """Low-precision output: keep an f32 VMEM accumulator, cast at finalize."""
    k = pl.program_id(2)

    @pl.when(k == 0)
    def _():
        acc_ref[...] = jnp.zeros_like(acc_ref)

    acc_ref[...] += jnp.dot(
        x_ref[...], wt_ref[...], preferred_element_type=jnp.float32
    )

    @pl.when(k == pl.num_programs(2) - 1)
    def _():
        o_ref[...] = ((acc_ref[...] + b_ref[...]) * inv_scale).astype(o_ref.dtype)


def _round_up(v, m):
    return ((v + m - 1) // m) * m


def _pick_tile(dim, cap, align):
    """Largest tile <= cap (multiple of `align`) that minimizes padding of dim."""
    padded = _round_up(dim, align)
    if padded <= cap:
        return padded
    n_tiles = -(-padded // cap)                     # ceil
    return _round_up(-(-padded // n_tiles), align)  # ceil then align


def _vmem_limit_bytes():
    """75% of physical VMEM (v5e/v6e: ~96 MiB, v7x: ~48 MiB); safe fallback."""
    try:
        cap = getattr(pltpu.get_tpu_info(), "vmem_capacity_bytes", None)
        if cap:
            return int(cap * 3 // 4)
    except Exception:
        pass
    return 48 * 1024 * 1024


def mono_linear(x, w, b, *, tm=512, tn=1024, tk=1024,
                compute_dtype=jnp.bfloat16, small_shape_fallback=True):
    """y = linear(x, clamp(w, 0), b) / (2 * in_features) via a tiled Pallas kernel.

    x: (batch, in_features)
    w: (out_features, in_features)   (PyTorch nn.Linear layout)
    b: (out_features,)
    """
    batch, in_features = x.shape
    out_features, in_features_w = w.shape
    assert in_features == in_features_w
    assert b.shape == (out_features,)

    inv_scale = 1.0 / (2.0 * in_features)   # uses the *logical* in_features
    out_dtype = x.dtype

    # Tiny problems: pallas launch + pad/transpose overhead dominates -> fused XLA.
    if small_shape_fallback and batch * in_features * out_features < (1 << 18):
        return ((x @ jnp.maximum(w, 0.0).T + b) * inv_scale).astype(out_dtype)

    # Padding-aware, layout-aligned tile sizes.
    m_align = 16 if jnp.dtype(compute_dtype).itemsize == 2 else 8
    tm = _pick_tile(batch, tm, m_align)
    tn = _pick_tile(out_features, tn, 128)
    tk = _pick_tile(in_features, tk, 128)

    Mp = _round_up(batch, tm)
    Kp = _round_up(in_features, tk)
    Np = _round_up(out_features, tn)

    # One fused wrapper pass per operand: clamp + transpose + cast + pad.
    # Zero padding is exact: clamp(0)=0 for weights, zero x columns add nothing.
    xp = jnp.pad(x.astype(compute_dtype),
                 ((0, Mp - batch), (0, Kp - in_features)))
    wtp = jnp.pad(jnp.maximum(w, 0.0).T.astype(compute_dtype),
                  ((0, Kp - in_features), (0, Np - out_features)))
    bp = jnp.pad(b.astype(jnp.float32).reshape(1, out_features),
                 ((0, 0), (0, Np - out_features)))

    grid = (Mp // tm, Np // tn, Kp // tk)

    if out_dtype == jnp.float32:
        kernel = functools.partial(_mono_linear_kernel_direct, inv_scale=inv_scale)
        scratch_shapes = []
    else:
        kernel = functools.partial(_mono_linear_kernel_scratch, inv_scale=inv_scale)
        scratch_shapes = [pltpu.VMEM((tm, tn), jnp.float32)]

    in_sz = jnp.dtype(compute_dtype).itemsize
    out_sz = jnp.dtype(out_dtype).itemsize
    cost = pl.CostEstimate(
        flops=2 * Mp * Np * Kp,
        transcendentals=0,
        bytes_accessed=(Mp * Kp * in_sz * grid[1]     # x re-streamed per j
                        + Kp * Np * in_sz * grid[0]   # w re-streamed per i
                        + Np * 4 * grid[0]            # bias
                        + Mp * Np * out_sz),          # output written once
    )

    out_padded = pl.pallas_call(
        kernel,
        out_shape=jax.ShapeDtypeStruct((Mp, Np), out_dtype),
        grid_spec=pltpu.PrefetchScalarGridSpec(
            num_scalar_prefetch=0,
            grid=grid,
            in_specs=[
                pl.BlockSpec((tm, tk), lambda i, j, k: (i, k)),
                pl.BlockSpec((tk, tn), lambda i, j, k: (k, j)),
                pl.BlockSpec((1, tn), lambda i, j, k: (0, j)),
            ],
            out_specs=pl.BlockSpec((tm, tn), lambda i, j, k: (i, j)),
            scratch_shapes=scratch_shapes,
        ),
        compiler_params=pltpu.CompilerParams(
            dimension_semantics=("parallel", "parallel", "arbitrary"),
            vmem_limit_bytes=_vmem_limit_bytes(),
        ),
        cost_estimate=cost,
    )(xp, wtp, bp)

    return out_padded[:batch, :out_features]


def _reference(x, w, b):
    in_features = x.shape[-1]
    return (x @ jnp.maximum(w, 0.0).T + b) / (2.0 * in_features)


if __name__ == "__main__":
    key = jax.random.PRNGKey(0)

    # --- Module's natural small shape: (8, 32) -> (8, 16) -------------------
    batch, in_f, out_f = 8, 32, 16
    k_x, k_w = jax.random.split(key)
    # MonoLinear.__init__: w = randn(out, in) + 2 ; b = zeros(out)
    w = jax.random.normal(k_w, (out_f, in_f), jnp.float32) + 2.0
    b = jnp.zeros((out_f,), jnp.float32)
    x = jax.random.normal(k_x, (batch, in_f), jnp.float32)
    ref = _reference(x, w, b)

    # Fast path (fused XLA expression for tiny problems).
    out_fast = jax.block_until_ready(mono_linear(x, w, b))
    assert out_fast.shape == ref.shape
    assert jnp.allclose(out_fast, ref, atol=1e-5, rtol=1e-5), "fast-path mismatch"

    # Force the Pallas kernel on the tiny shape too (f32 compute path).
    out_pl = jax.block_until_ready(
        mono_linear(x, w, b, compute_dtype=jnp.float32, small_shape_fallback=False))
    assert jnp.allclose(out_pl, ref, atol=1e-5, rtol=1e-5), "small Pallas mismatch"

    # --- Multi-tile shape: exercises k-accumulation, padding, bf16 MXU path --
    batch2, in2, out2 = 128, 384, 320
    k_x2, k_w2 = jax.random.split(jax.random.PRNGKey(1))
    w2 = jax.random.normal(k_w2, (out2, in2), jnp.float32) + 2.0
    b2 = jax.random.normal(jax.random.PRNGKey(2), (out2,), jnp.float32)
    x2 = jax.random.normal(k_x2, (batch2, in2), jnp.float32)
    ref2 = _reference(x2, w2, b2)

    # Default bf16 MXU inputs with f32 accumulation (small tiles -> 2x3x3 grid).
    out2_bf16 = jax.block_until_ready(
        mono_linear(x2, w2, b2, tm=64, tn=128, tk=128, small_shape_fallback=False))
    assert jnp.allclose(out2_bf16, ref2, atol=3e-3, rtol=3e-2), "bf16 tiled mismatch"

    # Strict f32 compute path on the same tiled grid.
    out2_f32 = jax.block_until_ready(
        mono_linear(x2, w2, b2, tm=64, tn=128, tk=128,
                    compute_dtype=jnp.float32, small_shape_fallback=False))
    assert jnp.allclose(out2_f32, ref2, atol=1e-4, rtol=1e-4), "f32 tiled mismatch"

    print("KERNEL_OK")
</pallas_src>

<mosaic_0001>
module attributes {stable_mosaic.version = 11 : i64} {
  func.func @_mono_linear_kernel_direct(%arg0: i32, %arg1: i32, %arg2: i32, %arg3: memref<8x128xf32, #tpu.memory_space<vmem>>, %arg4: memref<128x128xf32, #tpu.memory_space<vmem>>, %arg5: memref<1x128xf32, #tpu.memory_space<vmem>>, %arg6: memref<8x128xf32, #tpu.memory_space<vmem>>) attributes {dimension_semantics = [#tpu.dimension_semantics<parallel>, #tpu.dimension_semantics<parallel>, #tpu.dimension_semantics<arbitrary>], iteration_bounds = array<i64: 1, 1, 1>, scalar_prefetch = 0 : i64, scratch_operands = 0 : i64, tpu.core_type = #tpu.core_type<tc>, window_params = [{transform_indices = @transform_0, window_bounds = array<i64: 8, 128>}, {transform_indices = @transform_1, window_bounds = array<i64: 128, 128>}, {transform_indices = @transform_2, window_bounds = array<i64: 1, 128>}, {transform_indices = @transform_3, window_bounds = array<i64: 8, 128>}]} {
    %c0_i32 = arith.constant 0 : i32
    %0 = arith.cmpi eq, %arg2, %c0_i32 : i32
    %1 = arith.extui %0 : i1 to i32
    %c0_i32_0 = arith.constant 0 : i32
    %2 = arith.cmpi ne, %1, %c0_i32_0 : i32
    scf.if %2 {
      %cst_10 = arith.constant 0.000000e+00 : f32
      %12 = vector.broadcast %cst_10 : f32 to vector<8x128xf32>
      %c0_11 = arith.constant 0 : index
      %c0_12 = arith.constant 0 : index
      %13 = vector.load %arg6[%c0_11, %c0_12] : memref<8x128xf32, #tpu.memory_space<vmem>>, vector<8x128xf32>
      tpu.vector_store %arg6[%c0_11, %c0_12], %12 {strides = array<i32>} : memref<8x128xf32, #tpu.memory_space<vmem>>, vector<8x128xf32>,
    } else {
    }
    %c0 = arith.constant 0 : index
    %c0_1 = arith.constant 0 : index
    %3 = vector.load %arg6[%c0, %c0_1] : memref<8x128xf32, #tpu.memory_space<vmem>>, vector<8x128xf32>
    %c0_2 = arith.constant 0 : index
    %c0_3 = arith.constant 0 : index
    %4 = vector.load %arg3[%c0_2, %c0_3] : memref<8x128xf32, #tpu.memory_space<vmem>>, vector<8x128xf32>
    %c0_4 = arith.constant 0 : index
    %c0_5 = arith.constant 0 : index
    %5 = vector.load %arg4[%c0_4, %c0_5] : memref<128x128xf32, #tpu.memory_space<vmem>>, vector<128x128xf32>
    %cst = arith.constant dense<0.000000e+00> : vector<8x128xf32>
    %6 = tpu.matmul %4, %5, %cst {dimension_numbers = #tpu.dot_dimension_numbers<[1], [0], [0], [1], [0, 0, 1, 1], [], []>} : vector<8x128xf32>, vector<128x128xf32>, vector<8x128xf32> -> vector<8x128xf32>
    %7 = arith.addf %3, %6 : vector<8x128xf32>
    %c0_6 = arith.constant 0 : index
    %c0_7 = arith.constant 0 : index
    %8 = vector.load %arg6[%c0_6, %c0_7] : memref<8x128xf32, #tpu.memory_space<vmem>>, vector<8x128xf32>
    tpu.vector_store %arg6[%c0_6, %c0_7], %7 {strides = array<i32>} : memref<8x128xf32, #tpu.memory_space<vmem>>, vector<8x128xf32>,
    %c0_i32_8 = arith.constant 0 : i32
    %9 = arith.cmpi eq, %arg2, %c0_i32_8 : i32
    %10 = arith.extui %9 : i1 to i32
    %c0_i32_9 = arith.constant 0 : i32
    %11 = arith.cmpi ne, %10, %c0_i32_9 : i32
    scf.if %11 {
      %c0_10 = arith.constant 0 : index
      %c0_11 = arith.constant 0 : index
      %12 = vector.load %arg6[%c0_10, %c0_11] : memref<8x128xf32, #tpu.memory_space<vmem>>, vector<8x128xf32>
      %c0_12 = arith.constant 0 : index
      %c0_13 = arith.constant 0 : index
      %13 = vector.load %arg5[%c0_12, %c0_13] : memref<1x128xf32, #tpu.memory_space<vmem>>, vector<1x128xf32>
      %14 = vector.broadcast %13 : vector<1x128xf32> to vector<8x128xf32>
      %15 = arith.addf %12, %14 : vector<8x128xf32>
      %cst_14 = arith.constant 1.562500e-02 : f32
      %16 = vector.broadcast %cst_14 : f32 to vector<8x128xf32>
      %17 = arith.mulf %15, %16 : vector<8x128xf32>
      %c0_15 = arith.constant 0 : index
      %c0_16 = arith.constant 0 : index
      %18 = vector.load %arg6[%c0_15, %c0_16] : memref<8x128xf32, #tpu.memory_space<vmem>>, vector<8x128xf32>
      tpu.vector_store %arg6[%c0_15, %c0_16], %17 {strides = array<i32>} : memref<8x128xf32, #tpu.memory_space<vmem>>, vector<8x128xf32>,
    } else {
    }
    return
  }
  func.func @transform_0(%arg0: i32, %arg1: i32, %arg2: i32) -> (i32, i32) {
    %c0_i32 = arith.constant 0 : i32
    return %arg0, %arg2 : i32, i32
  }
  func.func @transform_1(%arg0: i32, %arg1: i32, %arg2: i32) -> (i32, i32) {
    %c0_i32 = arith.constant 0 : i32
    return %arg2, %arg1 : i32, i32
  }
  func.func @transform_2(%arg0: i32, %arg1: i32, %arg2: i32) -> (i32, i32) {
    %c0_i32 = arith.constant 0 : i32
    %c0_i32_0 = arith.constant 0 : i32
    return %c0_i32, %arg1 : i32, i32
  }
  func.func @transform_3(%arg0: i32, %arg1: i32, %arg2: i32) -> (i32, i32) {
    %c0_i32 = arith.constant 0 : i32
    return %arg0, %arg1 : i32, i32
  }
}

</mosaic_0001>

<bundles_post_ra>
// kernel: tpu_custom_call.1
= control target key start
LH: loop header
LB: loop body
LE: loop exit
PB: predicated region body
PF: predicated region fallthrough
CT: control target
= control target key end

     0   :  { %8 = vsyncpa [#allocation3], 0  ;;  %s331_s0 = inlined_call_operand.hbm [shape: f32[8,128], index: 0, kind: input, shape index: {}]   ;;  %s332_s1 = inlined_call_operand.hbm [shape: f32[128,128], index: 1, kind: input, shape index: {}]   ;;  %s333_s2 = inlined_call_operand.vmem [shape: f32[1,128], index: 2, kind: input, shape index: {}]   ;;  %s334_s3 = inlined_call_operand.hbm [shape: f32[8,128], index: 3, kind: output, shape index: {}]  }
   0x1   :  { %9 = vsyncpa [#allocation6], 0 }
   0x2   :  { %10 = vsyncpa [#allocation4], 0  ;;  %s292_s12 = smov [#allocation2]   ;;  %s293_s14 = smov [#allocation5]  }
   0x3   :  { %s17_s13 = sshll.u32 %s292_s12, 4  ;;  %s26_s15 = sshll.u32 %s293_s14, 4  ;;  %s18_s13 = int_to_ptr.vmem [resolvable:$true] %s17_s13  ;;  %s27_s15 = int_to_ptr.vmem [resolvable:$true] %s26_s15 }
   0x4   :  { %s234_s16 = scalar_lea.vmem %s18_s13, 128  ;;  %p239_p1 = scmp.lt.s32.totalorder %s18_s13, %s18_s13 }
   0x5   :  { %p235_p0 = scmp.ne.s32.totalorder %s18_s13, %s234_s16  ;;  %p240_p2 = scmp.lt.s32.totalorder %s234_s16, %s234_s16 }
   0x7   :  { %p241_p3 = por %p240_p2, %p239_p1 }
   0x9   :  { %p242_p4 = pnand %p241_p3, %p235_p0 }
   0xb   :  { %245 = shalt.err (!%p242_p4)
}
   0xc   :  { %20 = dma.hbm_to_vmem [thread:$0]  %s331_s0, 128, %s18_s13, [#allocation3]  }
   0xd   :  { %s254_s19 = scalar_lea.vmem %s27_s15, 2048  ;;  %p259_p6 = scmp.lt.s32.totalorder %s27_s15, %s27_s15 }
   0xe   :  { %p255_p5 = scmp.ne.s32.totalorder %s27_s15, %s254_s19  ;;  %p260_p7 = scmp.lt.s32.totalorder %s254_s19, %s254_s19 }
  0x10   :  { %p261_p8 = por %p260_p7, %p259_p6 }
  0x12   :  { %p262_p9 = pnand %p261_p8, %p255_p5 }
  0x14   :  { %265 = shalt.err (!%p262_p9)
}
  0x15   :  { %s294_s20 = smov 128   ;;  %s295_s21 = smov 8  }
  0x16   :  { %32 = dma.hbm_to_vmem [thread:$0]  %s332_s1, 2048, %s27_s15, [#allocation6], %s294_s20, %s294_s20, %s295_s21  }
  0x17   :  { %286 = dma.done.wait [#allocation3], 128  }
  0x18   :  { %287 = vsyncadd [#allocation3], 4294967168 }
  0x19   :  { %288 = dma.done.wait [#allocation6], 2048  }
  0x1a   :  { %289 = vsyncadd [#allocation6], 4294965248  ;;  %v296_v0 = vmov 0.0   ;;  %vm297_vm0 = vmmov 0   ;;  %v63_v1 = vld [vmem:[#allocation5 + $0x78] sm:$0xff]  ;;  %v62_v2 = vld [vmem:[#allocation5 + $0x70] sm:$0xff] }
  0x1b   :  { %184 = vmatprep.subr.mxu0 %v296_v0  ;;  %216 = vmatprep.mubr.msk.f32.mxu0 %vm297_vm0, %v296_v0  ;;  %v61_v3 = vld [vmem:[#allocation5 + $0x68] sm:$0xff]  ;;  %v60_v4 = vld [vmem:[#allocation5 + $0x60] sm:$0xff]  ;;  %v59_v5 = vld [vmem:[#allocation5 + $0x58] sm:$0xff]  ;;  %s298_s24 = smov [#allocation7]  }
  0x1c   :  { %185 = vmatpush3.msra.mxu0 %v63_v1  ;;  %v58_v6 = vld [vmem:[#allocation5 + $0x50] sm:$0xff]  ;;  %v57_v7 = vld [vmem:[#allocation5 + $0x48] sm:$0xff]  ;;  %v56_v8 = vld [vmem:[#allocation5 + $0x40] sm:$0xff]  ;;  %s156_s25 = sshll.u32 %s298_s24, 4  ;;  %s157_s25 = int_to_ptr.vmem [resolvable:$true] %s156_s25 }
  0x1d   :  { %186 = vmatprep.subr.mxu0 %v296_v0  ;;  %v55_v9 = vld [vmem:[#allocation5 + $0x38] sm:$0xff]  ;;  %v54_v10 = vld [vmem:[#allocation5 + $0x30] sm:$0xff]  ;;  %v53_v11 = vld [vmem:[#allocation5 + $0x28] sm:$0xff]  ;;  %s266_s26 = scalar_lea.vmem %s157_s25, 128  ;;  %p271_p11 = scmp.lt.s32.totalorder %s157_s25, %s157_s25 }
  0x1e   :  { %187 = vmatpush3.msra.mxu0 %v62_v2  ;;  %v52_v12 = vld [vmem:[#allocation5 + $0x20] sm:$0xff]  ;;  %v51_v13 = vld [vmem:[#allocation5 + $0x18] sm:$0xff]  ;;  %v50_v14 = vld [vmem:[#allocation5 + $0x10] sm:$0xff]  ;;  %p267_p10 = scmp.ne.s32.totalorder %s157_s25, %s266_s26  ;;  %p272_p12 = scmp.lt.s32.totalorder %s266_s26, %s266_s26 }
  0x1f   :  { %188 = vmatprep.subr.mxu0 %v296_v0  ;;  %v49_v15 = vld [vmem:[#allocation5 + $0x8] sm:$0xff]  ;;  %v48_v16 = vld [vmem:[#allocation5] sm:$0xff]  ;;  %v47_v17 = vld [vmem:[#allocation2] sm:$0xff] }
  0x20   :  { %189 = vmatpush3.msra.mxu0 %v61_v3  ;;  %v166_v19 = vld [vmem:[%s333_s2] ss:$0 sm:$0xff]  ;;  %p273_p13 = por %p272_p12, %p271_p11 }
  0x21   :  { %190 = vmatprep.subr.mxu0 %v296_v0 }
  0x22   :  { %191 = vmatpush3.msra.mxu0 %v60_v4  ;;  %p274_p0 = pnand %p273_p13, %p267_p10 }
  0x23   :  { %192 = vmatprep.subr.mxu0 %v296_v0 }
  0x24   :  { %193 = vmatpush3.msra.mxu0 %v59_v5 }
  0x25   :  { %194 = vmatprep.subr.mxu0 %v296_v0 }
  0x26   :  { %195 = vmatpush3.msra.mxu0 %v58_v6 }
  0x27   :  { %196 = vmatprep.subr.mxu0 %v296_v0 }
  0x28   :  { %197 = vmatpush3.msra.mxu0 %v57_v7 }
  0x29   :  { %198 = vmatprep.subr.mxu0 %v296_v0 }
  0x2a   :  { %199 = vmatpush3.msra.mxu0 %v56_v8 }
  0x2b   :  { %200 = vmatprep.subr.mxu0 %v296_v0 }
  0x2c   :  { %201 = vmatpush3.msra.mxu0 %v55_v9 }
  0x2d   :  { %202 = vmatprep.subr.mxu0 %v296_v0 }
  0x2e   :  { %203 = vmatpush3.msra.mxu0 %v54_v10 }
  0x2f   :  { %204 = vmatprep.subr.mxu0 %v296_v0 }
  0x30   :  { %205 = vmatpush3.msra.mxu0 %v53_v11 }
  0x31   :  { %206 = vmatprep.subr.mxu0 %v296_v0 }
  0x32   :  { %207 = vmatpush3.msra.mxu0 %v52_v12 }
  0x33   :  { %208 = vmatprep.subr.mxu0 %v296_v0 }
  0x34   :  { %209 = vmatpush3.msra.mxu0 %v51_v13 }
  0x35   :  { %210 = vmatprep.subr.mxu0 %v296_v0 }
  0x36   :  { %211 = vmatpush3.msra.mxu0 %v50_v14 }
  0x37   :  { %212 = vmatprep.subr.mxu0 %v296_v0 }
  0x38   :  { %213 = vmatpush3.msra.mxu0 %v49_v15 }
  0x39   :  { %214 = vmatprep.subr.mxu0 %v296_v0 }
  0x3a   :  { %215 = vmatpush3.msra.mxu0 %v48_v16 }
  0x3b   :  { %217 = vmatmul.mubr.f32.vlgmr.msra.gmra.mxu0 %v47_v17 }
  0xfb   :  { %v130_v18 = vpop.f32.mrf.mxu0 }
  0xfc   :  { %v147_v21 = vadd.f32 %v166_v19, %v130_v18 }
  0xfd   :  { %v218_v20 = vpop.f32.mrf.mxu0 }
  0xfe   :  { %v148_v22 = vmul.f32 0.015625, %v147_v21 }
 0x100   :  { %149 = vst [vmem:[#allocation7] sm:$0xff] %v148_v22 }
 0x101   :  { %277 = shalt.err (!%p274_p0)
}
 0x102   :  { %159 = dma.vmem_to_hbm [thread:$0]  %s157_s25, 128, %s334_s3, [#allocation4]  }
 0x103   :  { %290 = dma.done.wait [#allocation4], 128  }
 0x104   :  { %291 = vsyncadd [#allocation4], 4294967168 }
 0x105   :  { %163 = vsyncpa [#allocation3], 1 }
 0x106   :  { %164 = vsyncpa [#allocation6], 1 }
 0x107   :  { %165 = vsyncpa [#allocation4], 1 }

</bundles_post_ra>
